<compile_context>
chip_gen: v7x
topology: tpu7x:2x2x1
jax: 0.10.0
libtpu: 0.0.40
codegen_flags: <defaults>
</compile_context>

<pallas_src>
import functools
from typing import Any, NamedTuple

import jax
import jax.numpy as jnp
from jax.experimental import pallas as pl
from jax.experimental.pallas import tpu as pltpu


# ---------------------------------------------------------------------------
# capability probes (tiny cached kernels / queries, run outside jit)
# ---------------------------------------------------------------------------


@functools.lru_cache(maxsize=None)
def _detect_roll_mode() -> str:
    """Check pltpu.roll direction against np.roll; fall back to concat."""
    try:
        def k(x_ref, o_ref):
            o_ref[...] = pltpu.roll(x_ref[...], 1, 0)

        x = jnp.arange(8 * 128, dtype=jnp.float32).reshape(8, 128)
        y = pl.pallas_call(
            k, out_shape=jax.ShapeDtypeStruct((8, 128), jnp.float32))(x)
        if bool(jnp.array_equal(y, jnp.roll(x, 1, axis=0))):
            return "np"        # roll(x, s)[r] == x[r - s]
        if bool(jnp.array_equal(y, jnp.roll(x, -1, axis=0))):
            return "flipped"   # roll(x, s)[r] == x[r + s]
        return "concat"
    except Exception:
        return "concat"


@functools.lru_cache(maxsize=None)
def _supports_pipeline_mode() -> bool:
    """Probe BlockSpec(pipeline_mode=pl.Buffered(n)) support on this version."""
    try:
        def k(a_ref, b_ref, o_ref):
            o_ref[...] = a_ref[...] + b_ref[...]

        x = jnp.ones((8, 128), jnp.float32)
        y = pl.pallas_call(
            k,
            out_shape=jax.ShapeDtypeStruct((8, 128), jnp.float32),
            grid=(4,),
            in_specs=[
                pl.BlockSpec((8, 128), lambda i: (0, 0),
                             pipeline_mode=pl.Buffered(1)),
                pl.BlockSpec((8, 128), lambda i: (0, 0),
                             pipeline_mode=pl.Buffered(3)),
            ],
            out_specs=pl.BlockSpec((8, 128), lambda i: (0, 0)),
        )(x, x)
        jax.block_until_ready(y)
        return True
    except Exception:
        return False


@functools.lru_cache(maxsize=None)
def _vmem_capacity_bytes() -> int:
    try:
        info = pltpu.get_tpu_info()
        cap = getattr(info, "vmem_capacity_bytes", None)
        if cap:
            return int(cap)
    except Exception:
        pass
    return 64 * 1024 * 1024   # conservative: v7x per-TC VMEM


@functools.lru_cache(maxsize=None)
def _default_conv_mode() -> str:
    """v5e: 3 accumulating dots (single vst slot); otherwise fused-K concat."""
    try:
        kind = jax.devices()[0].device_kind.lower()
        if ("v5e" in kind) or ("v5" in kind and "lite" in kind):
            return "3dot"
    except Exception:
        pass
    return "fused"


def _shift_rows(h, direction, mode):
    """Circular row shift: out[r] = h[(r + direction) % rows].

    direction = -1 -> previous row, +1 -> next row.  Wrapped boundary rows are
    zeroed by the caller's sequence-boundary mask, so wrap content is harmless.
    """
    rows = h.shape[0]
    if mode == "concat":
        if direction == -1:
            return jnp.concatenate([h[rows - 1:, :], h[:rows - 1, :]], axis=0)
        return jnp.concatenate([h[1:, :], h[:1, :]], axis=0)
    shift = (-direction) if mode == "np" else direction
    return pltpu.roll(h, shift % rows, 0)


# ---------------------------------------------------------------------------
# Pallas kernel
# ---------------------------------------------------------------------------


def decoder_kernel(x_ref, pw_ref, pb_ref, w1_ref, b1_ref, w2_ref, b2_ref,
                   fcw_ref, fcb_ref, out_ref, h_ref, *stream_scratch,
                   seq_len, roll_mode, conv_mode, stream):
    """One row tile (Bb*seq_len rows) x one vocab tile.

    x_ref:   (TM, E)  bf16   embedded tokens (TM = Bb * seq_len)
    pw_ref:  (E, H)   bf16   proj (Conv1d k=1) weight
    pb_ref:  (1, H)   f32    proj bias
    w{1,2}_ref: resident -> (NB, 3H, H) bf16 VMEM block;
                stream   -> (NB, 3H, H) bf16 raw HBM ref (pl.ANY)
    b{1,2}_ref: (NB, 1, H)  f32 folded conv biases
    fcw_ref: (H, TV)  bf16   fc weight tile
    fcb_ref: (1, TV)  f32    fc bias tile
    out_ref: (TM, TV)        logits tile (f32 or bf16)
    h_ref:   (TM, H)  bf16   VMEM scratch, trunk output cached across v tiles
    stream_scratch (only when stream): w1buf, w2buf (2,3H,H) bf16, wsem (2,2)
    """
    tm = x_ref.shape[0]
    hidden = pw_ref.shape[1]
    num_blocks = b1_ref.shape[0]

    # ---- residual trunk: computed once per row tile (v-tile 0 only) -------
    @pl.when(pl.program_id(1) == 0)
    def _trunk():
        if stream:
            w1buf, w2buf, wsem = stream_scratch

            def fetch(blk, slot):
                pltpu.make_async_copy(w1_ref.at[blk], w1buf.at[slot],
                                      wsem.at[0, slot]).start()
                pltpu.make_async_copy(w2_ref.at[blk], w2buf.at[slot],
                                      wsem.at[1, slot]).start()

            fetch(0, 0)   # prime slot 0 while the proj matmul runs

        x = x_ref[...].astype(jnp.bfloat16)
        h = jnp.dot(x, pw_ref[...],
                    preferred_element_type=jnp.float32) + pb_ref[...]

        # Sequence-boundary masks (hoisted out of the block loop).  Rows are
        # Bb contiguous sequences of length seq_len, so position = row % L.
        pos = jax.lax.broadcasted_iota(jnp.int32, (tm, 1), 0) % seq_len
        mask_prev = (pos != 0).astype(jnp.float32)
        mask_next = (pos != seq_len - 1).astype(jnp.float32)

        def conv3(h, w, bias):
            # Conv1d(k=3, pad=1); w is the tap-stacked (3H, H) bf16 weight.
            hp = _shift_rows(h, -1, roll_mode) * mask_prev   # x[l-1]
            hn = _shift_rows(h, +1, roll_mode) * mask_next   # x[l+1]
            if conv_mode == "3dot":
                acc = jnp.dot(hp.astype(jnp.bfloat16), w[:hidden, :],
                              preferred_element_type=jnp.float32)
                acc = acc + jnp.dot(h.astype(jnp.bfloat16),
                                    w[hidden:2 * hidden, :],
                                    preferred_element_type=jnp.float32)
                acc = acc + jnp.dot(hn.astype(jnp.bfloat16), w[2 * hidden:, :],
                                    preferred_element_type=jnp.float32)
                return acc + bias
            a = jnp.concatenate([hp.astype(jnp.bfloat16),
                                 h.astype(jnp.bfloat16),
                                 hn.astype(jnp.bfloat16)], axis=1)
            return jnp.dot(a, w, preferred_element_type=jnp.float32) + bias

        if stream:
            def block(blk, h):
                slot = jax.lax.rem(blk, 2)
                pltpu.make_async_copy(w1_ref.at[0], w1buf.at[slot],
                                      wsem.at[0, slot]).wait()
                pltpu.make_async_copy(w2_ref.at[0], w2buf.at[slot],
                                      wsem.at[1, slot]).wait()

                @pl.when(blk + 1 < num_blocks)
                def _():
                    fetch(blk + 1, 1 - slot)

                y = jnp.maximum(conv3(h, w1buf[slot], b1_ref[blk]), 0.0)
                y = conv3(y, w2buf[slot], b2_ref[blk])
                return jnp.maximum(y + h, 0.0)

            h = jax.lax.fori_loop(0, num_blocks, block, h)
        else:
            def block(blk, h):
                y = jnp.maximum(conv3(h, w1_ref[blk], b1_ref[blk]), 0.0)
                y = conv3(y, w2_ref[blk], b2_ref[blk])
                return jnp.maximum(y + h, 0.0)

            h = jax.lax.fori_loop(0, num_blocks, block, h,
                                  unroll=num_blocks <= 4)

        h_ref[...] = h.astype(jnp.bfloat16)

    # ---- fc for this vocab tile --------------------------------------------
    out_ref[...] = (jnp.dot(h_ref[...], fcw_ref[...],
                            preferred_element_type=jnp.float32)
                    + fcb_ref[...]).astype(out_ref.dtype)


# ---------------------------------------------------------------------------
# host wrapper
# ---------------------------------------------------------------------------


class _Cfg(NamedTuple):
    roll_mode: str
    conv_mode: str
    stream: bool
    use_pm: bool
    vmem_cap: int
    out_dtype: Any


def _choose_bb(B, L, target_rows):
    """Batch elements per row tile: tm = bb*L near target, 16/8 aligned."""
    cands = [bb for bb in range(1, B + 1) if B % bb == 0]
    for align in (16, 8):
        ok = [bb for bb in cands if (bb * L) % align == 0 or bb == B]
        if not ok:
            continue
        under = [bb for bb in ok if bb * L <= target_rows]
        return max(under) if under else min(ok)
    return B


def _estimate_vmem_bytes(tm, E, H, tv, nb, stream, use_pm, fc_buf, out_bytes):
    wb = 1 if use_pm else 2                         # weight buffer count
    est = tm * E * 2 * 2                            # x tile (bf16, 2 bufs)
    est += tm * tv * out_bytes * 2                  # out tile
    est += tm * H * 2                               # h scratch (bf16)
    est += H * tv * 2 * fc_buf + tv * 4 * 2         # fc weight/bias tiles
    est += (E * H * 2 + H * 4) * wb                 # proj
    est += nb * H * 4 * 2 * wb                      # conv biases
    if stream:
        est += 2 * 2 * 3 * H * H * 2                # 2 tensors x 2 slots
    else:
        est += 2 * nb * 3 * H * H * 2 * wb          # resident w1+w2
    return est


def resnet_decoder_forward(tokens, prep, *, stream_weights=None,
                           conv_mode=None, out_dtype=jnp.float32):
    """tokens: int32 (B, L) -> logits (B, L, V) (f32 by default)."""
    H = prep["proj_w"].shape[1]
    nb = prep["w1"].shape[0]
    cap = _vmem_capacity_bytes()
    if stream_weights is None:
        # Stream conv weights when holding them all resident would eat a big
        # chunk of VMEM (critical for v7x's 64 MiB per-TC budget).
        conv_w_bytes = 2 * nb * 3 * H * H * 2
        stream_weights = conv_w_bytes > cap // 4
    if conv_mode is None:
        conv_mode = _default_conv_mode()
    cfg = _Cfg(_detect_roll_mode(), conv_mode, bool(stream_weights),
               _supports_pipeline_mode(), int(cap), out_dtype)
    return _forward_impl(tokens, prep, cfg)


@functools.partial(jax.jit, static_argnums=(2,))
def _forward_impl(tokens, prep, cfg):
    emb = jnp.take(prep["embedding"], tokens, axis=0)          # (B, L, E) bf16
    B, L, E = emb.shape
    H = prep["proj_w"].shape[1]
    V = prep["fc_w"].shape[1]
    nb = prep["w1"].shape[0]
    M = B * L
    x2d = emb.reshape(M, E)

    # --- row tiling: fuse whole sequences into the matmul M dimension -------
    target_rows = 512 if cfg.vmem_cap <= 96 * 1024 * 1024 else 1024
    bb = _choose_bb(B, L, target_rows)
    tm = bb * L
    n_row = M // tm

    # --- vocab tiling: pad V to a multiple of 128 for lane-dense stores -----
    Vp = ((V + 127) // 128) * 128
    fc_w, fc_b = prep["fc_w"], prep["fc_b"]
    if Vp != V:
        fc_w = jnp.pad(fc_w, ((0, 0), (0, Vp - V)))
        fc_b = jnp.pad(fc_b, ((0, 0), (0, Vp - V)))
    tv = min(next(t for t in (1024, 512, 256, 128) if Vp % t == 0), Vp)
    n_v = Vp // tv
    fc_buf = max(1, min(3, n_v))            # deeper fc-weight prefetch

    # --- BlockSpecs (single-buffer constant weights when supported) ---------
    def wspec(shape, imap):
        if cfg.use_pm:
            return pl.BlockSpec(shape, imap, pipeline_mode=pl.Buffered(1))
        return pl.BlockSpec(shape, imap)

    if cfg.use_pm:
        fcw_spec = pl.BlockSpec((H, tv), lambda i, j: (0, j),
                                pipeline_mode=pl.Buffered(fc_buf))
    else:
        fcw_spec = pl.BlockSpec((H, tv), lambda i, j: (0, j))

    if cfg.stream:
        w1_spec = pl.BlockSpec(memory_space=pl.ANY)
        w2_spec = pl.BlockSpec(memory_space=pl.ANY)
    else:
        w1_spec = wspec(prep["w1"].shape, lambda i, j: (0, 0, 0))
        w2_spec = wspec(prep["w2"].shape, lambda i, j: (0, 0, 0))

    scratch = [pltpu.VMEM((tm, H), jnp.bfloat16)]          # trunk cache (bf16)
    if cfg.stream:
        scratch += [pltpu.VMEM((2, 3 * H, H), jnp.bfloat16),
                    pltpu.VMEM((2, 3 * H, H), jnp.bfloat16),
                    pltpu.SemaphoreType.DMA((2, 2))]

    out_bytes = jnp.dtype(cfg.out_dtype).itemsize
    est = _estimate_vmem_bytes(tm, E, H, tv, nb, cfg.stream, cfg.use_pm,
                               fc_buf if cfg.use_pm else 2, out_bytes)
    vmem_limit = max(est + 16 * 1024 * 1024, 32 * 1024 * 1024)
    vmem_limit = int(min(vmem_limit, int(cfg.vmem_cap * 0.85)))

    kern = functools.partial(decoder_kernel, seq_len=L, roll_mode=cfg.roll_mode,
                             conv_mode=cfg.conv_mode, stream=cfg.stream)

    out = pl.pallas_call(
        kern,
        out_shape=jax.ShapeDtypeStruct((M, Vp), cfg.out_dtype),
        grid=(n_row, n_v),
        in_specs=[
            pl.BlockSpec((tm, E), lambda i, j: (i, 0)),
            wspec(prep["proj_w"].shape, lambda i, j: (0, 0)),
            wspec(prep["proj_b"].shape, lambda i, j: (0, 0)),
            w1_spec,
            wspec(prep["b1"].shape, lambda i, j: (0, 0, 0)),
            w2_spec,
            wspec(prep["b2"].shape, lambda i, j: (0, 0, 0)),
            fcw_spec,
            pl.BlockSpec((1, tv), lambda i, j: (0, j)),
        ],
        out_specs=pl.BlockSpec((tm, tv), lambda i, j: (i, j)),
        scratch_shapes=scratch,
        compiler_params=pltpu.CompilerParams(
            # NOTE: vocab axis must stay innermost + "arbitrary": the trunk
            # cache in scratch is reused across all v tiles of a row tile.
            dimension_semantics=("parallel", "arbitrary"),
            vmem_limit_bytes=vmem_limit,
        ),
    )(x2d, prep["proj_w"], prep["proj_b"], prep["w1"], prep["b1"],
      prep["w2"], prep["b2"], fc_w, fc_b)

    if Vp != V:
        out = out[:, :V]
    return out.reshape(B, L, V)


# ---------------------------------------------------------------------------
# parameter init (raw, PyTorch-like) and host-side preparation (fold + bf16)
# ---------------------------------------------------------------------------


def init_params(key, vocab_size, embed_dim, hidden_dim, num_blocks):
    ks = jax.random.split(key, 17)
    n, H = num_blocks, hidden_dim

    def nrm(k, shape, s):
        return s * jax.random.normal(k, shape, jnp.float32)

    return {
        "embedding": nrm(ks[0], (vocab_size, embed_dim), 0.5),
        # Conv1d(E->H, k=1): channels-last (Cin, Cout)
        "proj_w": nrm(ks[1], (embed_dim, H), 0.2),
        "proj_b": nrm(ks[2], (1, H), 0.1),
        # Conv1d(H->H, k=3): per-tap channels-last, w[b, k] maps x[l + k - 1]
        "w1": nrm(ks[3], (n, 3, H, H), 0.1),
        "b1": nrm(ks[4], (n, 1, H), 0.05),
        "w2": nrm(ks[5], (n, 3, H, H), 0.1),
        "b2": nrm(ks[6], (n, 1, H), 0.05),
        # BatchNorm1d running stats / affine params
        "g1": 1.0 + nrm(ks[7], (n, 1, H), 0.1),
        "be1": nrm(ks[8], (n, 1, H), 0.1),
        "m1": nrm(ks[9], (n, 1, H), 0.1),
        "v1": 1.0 + 0.1 * jnp.abs(jax.random.normal(ks[10], (n, 1, H), jnp.float32)),
        "g2": 1.0 + nrm(ks[11], (n, 1, H), 0.1),
        "be2": nrm(ks[12], (n, 1, H), 0.1),
        "m2": nrm(ks[13], (n, 1, H), 0.1),
        "v2": 1.0 + 0.1 * jnp.abs(jax.random.normal(ks[14], (n, 1, H), jnp.float32)),
        "fc_w": nrm(ks[15], (H, vocab_size), 0.2),
        "fc_b": jnp.zeros((1, vocab_size), jnp.float32),
    }


def prepare_params(raw, eps=1e-5):
    """Fold inference-mode BN into conv weights/bias, stack the 3 conv taps
    along K (tap-major (3H, H)), cast MXU operands (and the embedding table)
    to bfloat16.  Biases stay float32."""

    def fold(w, b, g, be, m, v):
        s = g * jax.lax.rsqrt(v + eps)                 # (NB, 1, Hout)
        wf = w * s[:, :, None, :]                      # scale per out channel
        bf = b * s + (be - m * s)                      # folded bias
        nb, k, hin, hout = wf.shape
        return wf.reshape(nb, k * hin, hout).astype(jnp.bfloat16), bf

    w1, b1 = fold(raw["w1"], raw["b1"], raw["g1"], raw["be1"], raw["m1"], raw["v1"])
    w2, b2 = fold(raw["w2"], raw["b2"], raw["g2"], raw["be2"], raw["m2"], raw["v2"])
    return {
        "embedding": raw["embedding"].astype(jnp.bfloat16),
        "proj_w": raw["proj_w"].astype(jnp.bfloat16),
        "proj_b": raw["proj_b"],
        "w1": w1, "b1": b1, "w2": w2, "b2": b2,
        "fc_w": raw["fc_w"].astype(jnp.bfloat16),
        "fc_b": raw["fc_b"],
    }


# ---------------------------------------------------------------------------
# pure-JAX references
# ---------------------------------------------------------------------------


def reference_forward_prepared(tokens, prep):
    """Reference with the same prepared (folded, bf16) weights as the kernel."""
    emb = jnp.take(prep["embedding"], tokens, axis=0)            # (B, L, E)
    h = (jnp.einsum("ble,eh->blh", emb.astype(jnp.bfloat16), prep["proj_w"],
                    preferred_element_type=jnp.float32) + prep["proj_b"])

    def conv3(h, w2d, b):
        zero = jnp.zeros_like(h[:, :1, :])
        hp = jnp.concatenate([zero, h[:, :-1, :]], axis=1)
        hn = jnp.concatenate([h[:, 1:, :], zero], axis=1)
        a = jnp.concatenate([hp, h, hn], axis=-1).astype(jnp.bfloat16)
        return jnp.einsum("blk,kh->blh", a, w2d,
                          preferred_element_type=jnp.float32) + b

    for i in range(prep["w1"].shape[0]):
        identity = h
        y = jnp.maximum(conv3(h, prep["w1"][i], prep["b1"][i]), 0.0)
        y = conv3(y, prep["w2"][i], prep["b2"][i])
        h = jnp.maximum(y + identity, 0.0)
    return (jnp.einsum("blh,hv->blv", h.astype(jnp.bfloat16), prep["fc_w"],
                       preferred_element_type=jnp.float32) + prep["fc_b"])


def reference_forward_f32(tokens, raw, eps=1e-5):
    """Full-f32 reference faithful to the PyTorch module (inference-mode BN)."""
    emb = jnp.take(raw["embedding"], tokens, axis=0)
    h = jnp.einsum("ble,eh->blh", emb, raw["proj_w"]) + raw["proj_b"]

    def conv3(h, w, b):   # w: (3, H, H) per-tap; out[l] = sum_k x[l+k-1] @ w[k]
        zero = jnp.zeros_like(h[:, :1, :])
        hp = jnp.concatenate([zero, h[:, :-1, :]], axis=1)
        hn = jnp.concatenate([h[:, 1:, :], zero], axis=1)
        return hp @ w[0] + h @ w[1] + hn @ w[2] + b

    def bn(x, g, be, m, v):
        return (x - m) * (g * jax.lax.rsqrt(v + eps)) + be

    for i in range(raw["w1"].shape[0]):
        identity = h
        y = conv3(h, raw["w1"][i], raw["b1"][i])
        y = jnp.maximum(bn(y, raw["g1"][i], raw["be1"][i], raw["m1"][i], raw["v1"][i]), 0.0)
        y = conv3(y, raw["w2"][i], raw["b2"][i])
        y = bn(y, raw["g2"][i], raw["be2"][i], raw["m2"][i], raw["v2"][i])
        h = jnp.maximum(y + identity, 0.0)
    return jnp.einsum("blh,hv->blv", h, raw["fc_w"]) + raw["fc_b"]


# ---------------------------------------------------------------------------
# main
# ---------------------------------------------------------------------------


if __name__ == "__main__":
    VOCAB, EMBED, HIDDEN, NUM_BLOCKS, MAX_LEN = 32, 16, 32, 2, 8
    B, L = 2, MAX_LEN

    key = jax.random.PRNGKey(0)
    k_tok, k_par = jax.random.split(key)
    tokens = jax.random.randint(k_tok, (B, L), 0, VOCAB, dtype=jnp.int32)

    raw = init_params(k_par, VOCAB, EMBED, HIDDEN, NUM_BLOCKS)
    prep = prepare_params(raw)

    ref_bf16 = reference_forward_prepared(tokens, prep)
    ref_f32 = reference_forward_f32(tokens, raw)

    # Default path (auto config: resident weights at these tiny shapes).
    logits = jax.block_until_ready(resnet_decoder_forward(tokens, prep))
    assert logits.shape == (B, L, VOCAB)
    assert jnp.allclose(logits, ref_bf16, atol=1e-2, rtol=1e-2), \
        "mismatch vs prepared-weight reference (default path)"
    assert jnp.allclose(logits, ref_f32, atol=0.1, rtol=0.1), \
        "mismatch vs f32 module reference (default path)"

    # Forced streaming-weight path (manual double-buffered HBM->VMEM DMA).
    logits_s = jax.block_until_ready(
        resnet_decoder_forward(tokens, prep, stream_weights=True))
    assert jnp.allclose(logits_s, ref_bf16, atol=1e-2, rtol=1e-2), \
        "mismatch vs prepared-weight reference (streaming path)"

    # Forced 3-accumulating-dot conv path (v5e form).
    logits_3 = jax.block_until_ready(
        resnet_decoder_forward(tokens, prep, conv_mode="3dot"))
    assert jnp.allclose(logits_3, ref_bf16, atol=1e-2, rtol=1e-2), \
        "mismatch vs prepared-weight reference (3dot path)"

    print("KERNEL_OK")
</pallas_src>

<mosaic_0001>
module attributes {stable_mosaic.version = 11 : i64} {
  func.func @k(%arg0: memref<8x128xf32, #tpu.memory_space<vmem>>, %arg1: memref<8x128xf32, #tpu.memory_space<vmem>>) attributes {dimension_semantics = [], scalar_prefetch = 0 : i64, scratch_operands = 0 : i64, tpu.core_type = #tpu.core_type<tc>} {
    %c0 = arith.constant 0 : index
    %c0_0 = arith.constant 0 : index
    %0 = vector.load %arg0[%c0, %c0_0] : memref<8x128xf32, #tpu.memory_space<vmem>>, vector<8x128xf32>
    %c1_i32 = arith.constant 1 : i32
    %1 = tpu.dynamic_rotate %0 by %c1_i32 dim 0 : vector<8x128xf32>, i32 -> vector<8x128xf32>
    %c0_1 = arith.constant 0 : index
    %c0_2 = arith.constant 0 : index
    %2 = vector.load %arg1[%c0_1, %c0_2] : memref<8x128xf32, #tpu.memory_space<vmem>>, vector<8x128xf32>
    tpu.vector_store %arg1[%c0_1, %c0_2], %1 {strides = array<i32>} : memref<8x128xf32, #tpu.memory_space<vmem>>, vector<8x128xf32>,
    return
  }
}

module attributes {stable_mosaic.version = 11 : i64} {
  func.func @k(%arg0: i32, %arg1: memref<8x128xf32, #tpu.memory_space<vmem>>, %arg2: memref<8x128xf32, #tpu.memory_space<vmem>>, %arg3: memref<8x128xf32, #tpu.memory_space<vmem>>) attributes {dimension_semantics = [#tpu.dimension_semantics<arbitrary>], iteration_bounds = array<i64: 4>, scalar_prefetch = 0 : i64, scratch_operands = 0 : i64, tpu.core_type = #tpu.core_type<tc>, window_params = [{pipeline_mode = #tpu.pipeline_mode<synchronous>, transform_indices = @transform_0, window_bounds = array<i64: 8, 128>}, {pipeline_mode = #tpu.pipeline_mode<synchronous>, transform_indices = @transform_1, window_bounds = array<i64: 8, 128>}, {pipeline_mode = #tpu.pipeline_mode<synchronous>, transform_indices = @transform_2, window_bounds = array<i64: 8, 128>}]} {
    %c0 = arith.constant 0 : index
    %c0_0 = arith.constant 0 : index
    %0 = vector.load %arg1[%c0, %c0_0] : memref<8x128xf32, #tpu.memory_space<vmem>>, vector<8x128xf32>
    %c0_1 = arith.constant 0 : index
    %c0_2 = arith.constant 0 : index
    %1 = vector.load %arg2[%c0_1, %c0_2] : memref<8x128xf32, #tpu.memory_space<vmem>>, vector<8x128xf32>
    %2 = arith.addf %0, %1 : vector<8x128xf32>
    %c0_3 = arith.constant 0 : index
    %c0_4 = arith.constant 0 : index
    %3 = vector.load %arg3[%c0_3, %c0_4] : memref<8x128xf32, #tpu.memory_space<vmem>>, vector<8x128xf32>
    tpu.vector_store %arg3[%c0_3, %c0_4], %2 {strides = array<i32>} : memref<8x128xf32, #tpu.memory_space<vmem>>, vector<8x128xf32>,
    return
  }
  func.func @transform_0(%arg0: i32) -> (i32, i32) {
    %c0_i32 = arith.constant 0 : i32
    %c0_i32_0 = arith.constant 0 : i32
    %c0_i32_1 = arith.constant 0 : i32
    return %c0_i32, %c0_i32_0 : i32, i32
  }
  func.func @transform_1(%arg0: i32) -> (i32, i32) {
    %c0_i32 = arith.constant 0 : i32
    %c0_i32_0 = arith.constant 0 : i32
    %c0_i32_1 = arith.constant 0 : i32
    return %c0_i32, %c0_i32_0 : i32, i32
  }
  func.func @transform_2(%arg0: i32) -> (i32, i32) {
    %c0_i32 = arith.constant 0 : i32
    %c0_i32_0 = arith.constant 0 : i32
    %c0_i32_1 = arith.constant 0 : i32
    return %c0_i32, %c0_i32_0 : i32, i32
  }
}

module attributes {stable_mosaic.version = 11 : i64} {
  func.func @decoder_kernel(%arg0: i32, %arg1: i32, %arg2: memref<16x16xbf16, #tpu.memory_space<vmem>>, %arg3: memref<16x32xbf16, #tpu.memory_space<vmem>>, %arg4: memref<1x32xf32, #tpu.memory_space<vmem>>, %arg5: memref<2x96x32xbf16, #tpu.memory_space<vmem>>, %arg6: memref<2x1x32xf32, #tpu.memory_space<vmem>>, %arg7: memref<2x96x32xbf16, #tpu.memory_space<vmem>>, %arg8: memref<2x1x32xf32, #tpu.memory_space<vmem>>, %arg9: memref<32x128xbf16, #tpu.memory_space<vmem>>, %arg10: memref<1x128xf32, #tpu.memory_space<vmem>>, %arg11: memref<16x128xf32, #tpu.memory_space<vmem>>, %arg12: memref<16x32xbf16, #tpu.memory_space<vmem>>) attributes {dimension_semantics = [#tpu.dimension_semantics<parallel>, #tpu.dimension_semantics<arbitrary>], iteration_bounds = array<i64: 1, 1>, scalar_prefetch = 0 : i64, scratch_operands = 1 : i64, tpu.core_type = #tpu.core_type<tc>, window_params = [{transform_indices = @transform_0, window_bounds = array<i64: 16, 16>}, {pipeline_mode = #tpu.pipeline_mode<synchronous>, transform_indices = @transform_1, window_bounds = array<i64: 16, 32>}, {pipeline_mode = #tpu.pipeline_mode<synchronous>, transform_indices = @transform_2, window_bounds = array<i64: 1, 32>}, {pipeline_mode = #tpu.pipeline_mode<synchronous>, transform_indices = @transform_3, window_bounds = array<i64: 2, 96, 32>}, {pipeline_mode = #tpu.pipeline_mode<synchronous>, transform_indices = @transform_4, window_bounds = array<i64: 2, 1, 32>}, {pipeline_mode = #tpu.pipeline_mode<synchronous>, transform_indices = @transform_5, window_bounds = array<i64: 2, 96, 32>}, {pipeline_mode = #tpu.pipeline_mode<synchronous>, transform_indices = @transform_6, window_bounds = array<i64: 2, 1, 32>}, {transform_indices = @transform_7, window_bounds = array<i64: 32, 128>}, {transform_indices = @transform_8, window_bounds = array<i64: 1, 128>}, {transform_indices = @transform_9, window_bounds = array<i64: 16, 128>}]} {
    %c0_i32 = arith.constant 0 : i32
    %0 = arith.cmpi eq, %arg1, %c0_i32 : i32
    %1 = arith.extui %0 : i1 to i32
    %c0_i32_0 = arith.constant 0 : i32
    %2 = arith.cmpi ne, %1, %c0_i32_0 : i32
    scf.if %2 {
      %c0_8 = arith.constant 0 : index
      %c0_9 = arith.constant 0 : index
      %10 = vector.load %arg2[%c0_8, %c0_9] : memref<16x16xbf16, #tpu.memory_space<vmem>>, vector<16x16xbf16>
      %c0_10 = arith.constant 0 : index
      %c0_11 = arith.constant 0 : index
      %11 = vector.load %arg3[%c0_10, %c0_11] : memref<16x32xbf16, #tpu.memory_space<vmem>>, vector<16x32xbf16>
      %cst_12 = arith.constant dense<0.000000e+00> : vector<16x32xf32>
      %12 = tpu.matmul %10, %11, %cst_12 {dimension_numbers = #tpu.dot_dimension_numbers<[1], [0], [0], [1], [0, 0, 1, 1], [], []>} : vector<16x16xbf16>, vector<16x32xbf16>, vector<16x32xf32> -> vector<16x32xf32>
      %c0_13 = arith.constant 0 : index
      %c0_14 = arith.constant 0 : index
      %13 = vector.load %arg4[%c0_13, %c0_14] : memref<1x32xf32, #tpu.memory_space<vmem>>, vector<1x32xf32>
      %14 = vector.broadcast %13 : vector<1x32xf32> to vector<16x32xf32>
      %15 = arith.addf %12, %14 : vector<16x32xf32>
      %16 = tpu.iota {dimensions = array<i32: 0>} : vector<16x1xi32>
      %c8_i32 = arith.constant 8 : i32
      %c0_i32_15 = arith.constant 0 : i32
      %17 = arith.cmpi eq, %c8_i32, %c0_i32_15 : i32
      %c1_i32 = arith.constant 1 : i32
      %18 = arith.select %17, %c1_i32, %c8_i32 : i32
      %19 = vector.broadcast %18 : i32 to vector<16x1xi32>
      %20 = arith.remsi %16, %19 : vector<16x1xi32>
      %c0_i32_16 = arith.constant 0 : i32
      %21 = vector.broadcast %c0_i32_16 : i32 to vector<16x1xi32>
      %22 = arith.cmpi ne, %20, %21 : vector<16x1xi32>
      %c0_i32_17 = arith.constant 0 : i32
      %23 = vector.broadcast %c0_i32_17 : i32 to vector<16x1xi32>
      %24 = arith.cmpi slt, %20, %23 : vector<16x1xi32>
      %c0_i32_18 = arith.constant 0 : i32
      %25 = arith.cmpi slt, %18, %c0_i32_18 : i32
      %26 = vector.broadcast %25 : i1 to vector<16x1xi1>
      %27 = vector.broadcast %26 : vector<16x1xi1> to vector<16x1xi1>
      %28 = arith.xori %24, %27 : vector<16x1xi1>
      %29 = arith.andi %28, %22 : vector<16x1xi1>
      %30 = vector.broadcast %18 : i32 to vector<16x1xi32>
      %31 = arith.addi %20, %30 : vector<16x1xi32>
      %32 = arith.select %29, %31, %20 : vector<16x1xi1>, vector<16x1xi32>
      %c0_i32_19 = arith.constant 0 : i32
      %33 = vector.broadcast %c0_i32_19 : i32 to vector<16x1xi32>
      %34 = arith.cmpi ne, %32, %33 : vector<16x1xi32>
      %35 = arith.extui %34 : vector<16x1xi1> to vector<16x1xi32>
      %36 = arith.sitofp %35 : vector<16x1xi32> to vector<16x1xf32>
      %c7_i32 = arith.constant 7 : i32
      %37 = vector.broadcast %c7_i32 : i32 to vector<16x1xi32>
      %38 = arith.cmpi ne, %32, %37 : vector<16x1xi32>
      %39 = arith.extui %38 : vector<16x1xi1> to vector<16x1xi32>
      %40 = arith.sitofp %39 : vector<16x1xi32> to vector<16x1xf32>
      %c0_i32_20 = arith.constant 0 : i32
      %41 = arith.index_cast %c0_i32_20 : i32 to index
      %c0_21 = arith.constant 0 : index
      %c0_22 = arith.constant 0 : index
      %42 = vector.load %arg5[%41, %c0_21, %c0_22] : memref<2x96x32xbf16, #tpu.memory_space<vmem>>, vector<1x96x32xbf16>
      %43 = vector.shape_cast %42 : vector<1x96x32xbf16> to vector<96x32xbf16>
      %44 = arith.index_cast %c0_i32_20 : i32 to index
      %c0_23 = arith.constant 0 : index
      %c0_24 = arith.constant 0 : index
      %45 = vector.load %arg6[%44, %c0_23, %c0_24] : memref<2x1x32xf32, #tpu.memory_space<vmem>>, vector<1x1x32xf32>
      %46 = vector.shape_cast %45 : vector<1x1x32xf32> to vector<1x32xf32>
      %47 = vector.extract_strided_slice %15 {offsets = [15, 0], sizes = [1, 32], strides = [1, 1]} : vector<16x32xf32> to vector<1x32xf32>
      %48 = vector.extract_strided_slice %15 {offsets = [0, 0], sizes = [15, 32], strides = [1, 1]} : vector<16x32xf32> to vector<15x32xf32>
      %49 = tpu.concatenate %47, %48 in 0 : vector<1x32xf32>, vector<15x32xf32> -> vector<16x32xf32>
      %50 = vector.broadcast %36 : vector<16x1xf32> to vector<16x32xf32>
      %51 = arith.mulf %49, %50 : vector<16x32xf32>
      %52 = vector.extract_strided_slice %15 {offsets = [1, 0], sizes = [15, 32], strides = [1, 1]} : vector<16x32xf32> to vector<15x32xf32>
      %53 = vector.extract_strided_slice %15 {offsets = [0, 0], sizes = [1, 32], strides = [1, 1]} : vector<16x32xf32> to vector<1x32xf32>
      %54 = tpu.concatenate %52, %53 in 0 : vector<15x32xf32>, vector<1x32xf32> -> vector<16x32xf32>
      %55 = vector.broadcast %40 : vector<16x1xf32> to vector<16x32xf32>
      %56 = arith.mulf %54, %55 : vector<16x32xf32>
      %57 = arith.truncf %51 : vector<16x32xf32> to vector<16x32xbf16>
      %58 = arith.truncf %15 : vector<16x32xf32> to vector<16x32xbf16>
      %59 = arith.truncf %56 : vector<16x32xf32> to vector<16x32xbf16>
      %60 = tpu.concatenate %57, %58, %59 in 1 : vector<16x32xbf16>, vector<16x32xbf16>, vector<16x32xbf16> -> vector<16x96xbf16>
      %cst_25 = arith.constant dense<0.000000e+00> : vector<16x32xf32>
      %61 = tpu.matmul %60, %43, %cst_25 {dimension_numbers = #tpu.dot_dimension_numbers<[1], [0], [0], [1], [0, 0, 1, 1], [], []>} : vector<16x96xbf16>, vector<96x32xbf16>, vector<16x32xf32> -> vector<16x32xf32>
      %62 = vector.broadcast %46 : vector<1x32xf32> to vector<16x32xf32>
      %63 = arith.addf %61, %62 : vector<16x32xf32>
      %cst_26 = arith.constant 0.000000e+00 : f32
      %64 = vector.broadcast %cst_26 : f32 to vector<16x32xf32>
      %65 = arith.maximumf %63, %64 : vector<16x32xf32>
      %66 = arith.index_cast %c0_i32_20 : i32 to index
      %c0_27 = arith.constant 0 : index
      %c0_28 = arith.constant 0 : index
      %67 = vector.load %arg7[%66, %c0_27, %c0_28] : memref<2x96x32xbf16, #tpu.memory_space<vmem>>, vector<1x96x32xbf16>
      %68 = vector.shape_cast %67 : vector<1x96x32xbf16> to vector<96x32xbf16>
      %69 = arith.index_cast %c0_i32_20 : i32 to index
      %c0_29 = arith.constant 0 : index
      %c0_30 = arith.constant 0 : index
      %70 = vector.load %arg8[%69, %c0_29, %c0_30] : memref<2x1x32xf32, #tpu.memory_space<vmem>>, vector<1x1x32xf32>
      %71 = vector.shape_cast %70 : vector<1x1x32xf32> to vector<1x32xf32>
      %72 = vector.extract_strided_slice %65 {offsets = [15, 0], sizes = [1, 32], strides = [1, 1]} : vector<16x32xf32> to vector<1x32xf32>
      %73 = vector.extract_strided_slice %65 {offsets = [0, 0], sizes = [15, 32], strides = [1, 1]} : vector<16x32xf32> to vector<15x32xf32>
      %74 = tpu.concatenate %72, %73 in 0 : vector<1x32xf32>, vector<15x32xf32> -> vector<16x32xf32>
      %75 = vector.broadcast %36 : vector<16x1xf32> to vector<16x32xf32>
      %76 = arith.mulf %74, %75 : vector<16x32xf32>
      %77 = vector.extract_strided_slice %65 {offsets = [1, 0], sizes = [15, 32], strides = [1, 1]} : vector<16x32xf32> to vector<15x32xf32>
      %78 = vector.extract_strided_slice %65 {offsets = [0, 0], sizes = [1, 32], strides = [1, 1]} : vector<16x32xf32> to vector<1x32xf32>
      %79 = tpu.concatenate %77, %78 in 0 : vector<15x32xf32>, vector<1x32xf32> -> vector<16x32xf32>
      %80 = vector.broadcast %40 : vector<16x1xf32> to vector<16x32xf32>
      %81 = arith.mulf %79, %80 : vector<16x32xf32>
      %82 = arith.truncf %76 : vector<16x32xf32> to vector<16x32xbf16>
      %83 = arith.truncf %65 : vector<16x32xf32> to vector<16x32xbf16>
      %84 = arith.truncf %81 : vector<16x32xf32> to vector<16x32xbf16>
      %85 = tpu.concatenate %82, %83, %84 in 1 : vector<16x32xbf16>, vector<16x32xbf16>, vector<16x32xbf16> -> vector<16x96xbf16>
      %cst_31 = arith.constant dense<0.000000e+00> : vector<16x32xf32>
      %86 = tpu.matmul %85, %68, %cst_31 {dimension_numbers = #tpu.dot_dimension_numbers<[1], [0], [0], [1], [0, 0, 1, 1], [], []>} : vector<16x96xbf16>, vector<96x32xbf16>, vector<16x32xf32> -> vector<16x32xf32>
      %87 = vector.broadcast %71 : vector<1x32xf32> to vector<16x32xf32>
      %88 = arith.addf %86, %87 : vector<16x32xf32>
      %89 = arith.addf %88, %15 : vector<16x32xf32>
      %cst_32 = arith.constant 0.000000e+00 : f32
      %90 = vector.broadcast %cst_32 : f32 to vector<16x32xf32>
      %91 = arith.maximumf %89, %90 : vector<16x32xf32>
      %c1_i32_33 = arith.constant 1 : i32
      %92 = arith.index_cast %c1_i32_33 : i32 to index
      %c0_34 = arith.constant 0 : index
      %c0_35 = arith.constant 0 : index
      %93 = vector.load %arg5[%92, %c0_34, %c0_35] : memref<2x96x32xbf16, #tpu.memory_space<vmem>>, vector<1x96x32xbf16>
      %94 = vector.shape_cast %93 : vector<1x96x32xbf16> to vector<96x32xbf16>
      %95 = arith.index_cast %c1_i32_33 : i32 to index
      %c0_36 = arith.constant 0 : index
      %c0_37 = arith.constant 0 : index
      %96 = vector.load %arg6[%95, %c0_36, %c0_37] : memref<2x1x32xf32, #tpu.memory_space<vmem>>, vector<1x1x32xf32>
      %97 = vector.shape_cast %96 : vector<1x1x32xf32> to vector<1x32xf32>
      %98 = vector.extract_strided_slice %91 {offsets = [15, 0], sizes = [1, 32], strides = [1, 1]} : vector<16x32xf32> to vector<1x32xf32>
      %99 = vector.extract_strided_slice %91 {offsets = [0, 0], sizes = [15, 32], strides = [1, 1]} : vector<16x32xf32> to vector<15x32xf32>
      %100 = tpu.concatenate %98, %99 in 0 : vector<1x32xf32>, vector<15x32xf32> -> vector<16x32xf32>
      %101 = vector.broadcast %36 : vector<16x1xf32> to vector<16x32xf32>
      %102 = arith.mulf %100, %101 : vector<16x32xf32>
      %103 = vector.extract_strided_slice %91 {offsets = [1, 0], sizes = [15, 32], strides = [1, 1]} : vector<16x32xf32> to vector<15x32xf32>
      %104 = vector.extract_strided_slice %91 {offsets = [0, 0], sizes = [1, 32], strides = [1, 1]} : vector<16x32xf32> to vector<1x32xf32>
      %105 = tpu.concatenate %103, %104 in 0 : vector<15x32xf32>, vector<1x32xf32> -> vector<16x32xf32>
      %106 = vector.broadcast %40 : vector<16x1xf32> to vector<16x32xf32>
      %107 = arith.mulf %105, %106 : vector<16x32xf32>
      %108 = arith.truncf %102 : vector<16x32xf32> to vector<16x32xbf16>
      %109 = arith.truncf %91 : vector<16x32xf32> to vector<16x32xbf16>
      %110 = arith.truncf %107 : vector<16x32xf32> to vector<16x32xbf16>
      %111 = tpu.concatenate %108, %109, %110 in 1 : vector<16x32xbf16>, vector<16x32xbf16>, vector<16x32xbf16> -> vector<16x96xbf16>
      %cst_38 = arith.constant dense<0.000000e+00> : vector<16x32xf32>
      %112 = tpu.matmul %111, %94, %cst_38 {dimension_numbers = #tpu.dot_dimension_numbers<[1], [0], [0], [1], [0, 0, 1, 1], [], []>} : vector<16x96xbf16>, vector<96x32xbf16>, vector<16x32xf32> -> vector<16x32xf32>
      %113 = vector.broadcast %97 : vector<1x32xf32> to vector<16x32xf32>
      %114 = arith.addf %112, %113 : vector<16x32xf32>
      %cst_39 = arith.constant 0.000000e+00 : f32
      %115 = vector.broadcast %cst_39 : f32 to vector<16x32xf32>
      %116 = arith.maximumf %114, %115 : vector<16x32xf32>
      %117 = arith.index_cast %c1_i32_33 : i32 to index
      %c0_40 = arith.constant 0 : index
      %c0_41 = arith.constant 0 : index
      %118 = vector.load %arg7[%117, %c0_40, %c0_41] : memref<2x96x32xbf16, #tpu.memory_space<vmem>>, vector<1x96x32xbf16>
      %119 = vector.shape_cast %118 : vector<1x96x32xbf16> to vector<96x32xbf16>
      %120 = arith.index_cast %c1_i32_33 : i32 to index
      %c0_42 = arith.constant 0 : index
      %c0_43 = arith.constant 0 : index
      %121 = vector.load %arg8[%120, %c0_42, %c0_43] : memref<2x1x32xf32, #tpu.memory_space<vmem>>, vector<1x1x32xf32>
      %122 = vector.shape_cast %121 : vector<1x1x32xf32> to vector<1x32xf32>
      %123 = vector.extract_strided_slice %116 {offsets = [15, 0], sizes = [1, 32], strides = [1, 1]} : vector<16x32xf32> to vector<1x32xf32>
      %124 = vector.extract_strided_slice %116 {offsets = [0, 0], sizes = [15, 32], strides = [1, 1]} : vector<16x32xf32> to vector<15x32xf32>
      %125 = tpu.concatenate %123, %124 in 0 : vector<1x32xf32>, vector<15x32xf32> -> vector<16x32xf32>
      %126 = vector.broadcast %36 : vector<16x1xf32> to vector<16x32xf32>
      %127 = arith.mulf %125, %126 : vector<16x32xf32>
      %128 = vector.extract_strided_slice %116 {offsets = [1, 0], sizes = [15, 32], strides = [1, 1]} : vector<16x32xf32> to vector<15x32xf32>
      %129 = vector.extract_strided_slice %116 {offsets = [0, 0], sizes = [1, 32], strides = [1, 1]} : vector<16x32xf32> to vector<1x32xf32>
      %130 = tpu.concatenate %128, %129 in 0 : vector<15x32xf32>, vector<1x32xf32> -> vector<16x32xf32>
      %131 = vector.broadcast %40 : vector<16x1xf32> to vector<16x32xf32>
      %132 = arith.mulf %130, %131 : vector<16x32xf32>
      %133 = arith.truncf %127 : vector<16x32xf32> to vector<16x32xbf16>
      %134 = arith.truncf %116 : vector<16x32xf32> to vector<16x32xbf16>
      %135 = arith.truncf %132 : vector<16x32xf32> to vector<16x32xbf16>
      %136 = tpu.concatenate %133, %134, %135 in 1 : vector<16x32xbf16>, vector<16x32xbf16>, vector<16x32xbf16> -> vector<16x96xbf16>
      %cst_44 = arith.constant dense<0.000000e+00> : vector<16x32xf32>
      %137 = tpu.matmul %136, %119, %cst_44 {dimension_numbers = #tpu.dot_dimension_numbers<[1], [0], [0], [1], [0, 0, 1, 1], [], []>} : vector<16x96xbf16>, vector<96x32xbf16>, vector<16x32xf32> -> vector<16x32xf32>
      %138 = vector.broadcast %122 : vector<1x32xf32> to vector<16x32xf32>
      %139 = arith.addf %137, %138 : vector<16x32xf32>
      %140 = arith.addf %139, %91 : vector<16x32xf32>
      %cst_45 = arith.constant 0.000000e+00 : f32
      %141 = vector.broadcast %cst_45 : f32 to vector<16x32xf32>
      %142 = arith.maximumf %140, %141 : vector<16x32xf32>
      %c2_i32 = arith.constant 2 : i32
      %143 = arith.truncf %142 : vector<16x32xf32> to vector<16x32xbf16>
      %c0_46 = arith.constant 0 : index
      %c0_47 = arith.constant 0 : index
      %144 = vector.load %arg12[%c0_46, %c0_47] : memref<16x32xbf16, #tpu.memory_space<vmem>>, vector<16x32xbf16>
      tpu.vector_store %arg12[%c0_46, %c0_47], %143 {strides = array<i32>} : memref<16x32xbf16, #tpu.memory_space<vmem>>, vector<16x32xbf16>,
    } else {
    }
    %c0 = arith.constant 0 : index
    %c0_1 = arith.constant 0 : index
    %3 = vector.load %arg12[%c0, %c0_1] : memref<16x32xbf16, #tpu.memory_space<vmem>>, vector<16x32xbf16>
    %c0_2 = arith.constant 0 : index
    %c0_3 = arith.constant 0 : index
    %4 = vector.load %arg9[%c0_2, %c0_3] : memref<32x128xbf16, #tpu.memory_space<vmem>>, vector<32x128xbf16>
    %cst = arith.constant dense<0.000000e+00> : vector<16x128xf32>
    %5 = tpu.matmul %3, %4, %cst {dimension_numbers = #tpu.dot_dimension_numbers<[1], [0], [0], [1], [0, 0, 1, 1], [], []>} : vector<16x32xbf16>, vector<32x128xbf16>, vector<16x128xf32> -> vector<16x128xf32>
    %c0_4 = arith.constant 0 : index
    %c0_5 = arith.constant 0 : index
    %6 = vector.load %arg10[%c0_4, %c0_5] : memref<1x128xf32, #tpu.memory_space<vmem>>, vector<1x128xf32>
    %7 = vector.broadcast %6 : vector<1x128xf32> to vector<16x128xf32>
    %8 = arith.addf %5, %7 : vector<16x128xf32>
    %c0_6 = arith.constant 0 : index
    %c0_7 = arith.constant 0 : index
    %9 = vector.load %arg11[%c0_6, %c0_7] : memref<16x128xf32, #tpu.memory_space<vmem>>, vector<16x128xf32>
    tpu.vector_store %arg11[%c0_6, %c0_7], %8 {strides = array<i32>} : memref<16x128xf32, #tpu.memory_space<vmem>>, vector<16x128xf32>,
    return
  }
  func.func @transform_0(%arg0: i32, %arg1: i32) -> (i32, i32) {
    %c0_i32 = arith.constant 0 : i32
    %c0_i32_0 = arith.constant 0 : i32
    return %arg0, %c0_i32 : i32, i32
  }
  func.func @transform_1(%arg0: i32, %arg1: i32) -> (i32, i32) {
    %c0_i32 = arith.constant 0 : i32
    %c0_i32_0 = arith.constant 0 : i32
    %c0_i32_1 = arith.constant 0 : i32
    return %c0_i32, %c0_i32_0 : i32, i32
  }
  func.func @transform_2(%arg0: i32, %arg1: i32) -> (i32, i32) {
    %c0_i32 = arith.constant 0 : i32
    %c0_i32_0 = arith.constant 0 : i32
    %c0_i32_1 = arith.constant 0 : i32
    return %c0_i32, %c0_i32_0 : i32, i32
  }
  func.func @transform_3(%arg0: i32, %arg1: i32) -> (i32, i32, i32) {
    %c0_i32 = arith.constant 0 : i32
    %c0_i32_0 = arith.constant 0 : i32
    %c0_i32_1 = arith.constant 0 : i32
    %c0_i32_2 = arith.constant 0 : i32
    return %c0_i32, %c0_i32_0, %c0_i32_1 : i32, i32, i32
  }
  func.func @transform_4(%arg0: i32, %arg1: i32) -> (i32, i32, i32) {
    %c0_i32 = arith.constant 0 : i32
    %c0_i32_0 = arith.constant 0 : i32
    %c0_i32_1 = arith.constant 0 : i32
    %c0_i32_2 = arith.constant 0 : i32
    return %c0_i32, %c0_i32_0, %c0_i32_1 : i32, i32, i32
  }
  func.func @transform_5(%arg0: i32, %arg1: i32) -> (i32, i32, i32) {
    %c0_i32 = arith.constant 0 : i32
    %c0_i32_0 = arith.constant 0 : i32
    %c0_i32_1 = arith.constant 0 : i32
    %c0_i32_2 = arith.constant 0 : i32
    return %c0_i32, %c0_i32_0, %c0_i32_1 : i32, i32, i32
  }
  func.func @transform_6(%arg0: i32, %arg1: i32) -> (i32, i32, i32) {
    %c0_i32 = arith.constant 0 : i32
    %c0_i32_0 = arith.constant 0 : i32
    %c0_i32_1 = arith.constant 0 : i32
    %c0_i32_2 = arith.constant 0 : i32
    return %c0_i32, %c0_i32_0, %c0_i32_1 : i32, i32, i32
  }
  func.func @transform_7(%arg0: i32, %arg1: i32) -> (i32, i32) {
    %c0_i32 = arith.constant 0 : i32
    %c0_i32_0 = arith.constant 0 : i32
    return %c0_i32, %arg1 : i32, i32
  }
  func.func @transform_8(%arg0: i32, %arg1: i32) -> (i32, i32) {
    %c0_i32 = arith.constant 0 : i32
    %c0_i32_0 = arith.constant 0 : i32
    return %c0_i32, %arg1 : i32, i32
  }
  func.func @transform_9(%arg0: i32, %arg1: i32) -> (i32, i32) {
    %c0_i32 = arith.constant 0 : i32
    return %arg0, %arg1 : i32, i32
  }
}

</mosaic_0001>

<bundles_post_ra>
// kernel: tpu_custom_call.1
= control target key start
LH: loop header
LB: loop body
LE: loop exit
PB: predicated region body
PF: predicated region fallthrough
CT: control target
= control target key end

     0   :  { %6 = vsyncpa [#allocation3], 0  ;;  %s125_s0 = inlined_call_operand.hbm [shape: f32[8,128], index: 0, kind: input, shape index: {}]   ;;  %s126_s1 = inlined_call_operand.hbm [shape: f32[8,128], index: 1, kind: output, shape index: {}]  }
   0x1   :  { %7 = vsyncpa [#allocation4], 0  ;;  %s89_s6 = smov [#allocation2]   ;;  %s41_s10 = scalar_lea.hbm %s125_s0, 128 }
   0x2   :  { %s14_s7 = sshll.u32 %s89_s6, 4  ;;  %p42_p0 = scmp.ne.s32.totalorder %s125_s0, %s41_s10  ;;  %s15_s7 = int_to_ptr.vmem [resolvable:$true] %s14_s7 }
   0x3   :  { %p45_p1 = scmp.lt.u32.totalorder %s41_s10, %s125_s0 }
   0x5   :  { %p47_p2 = pnand %p45_p1, %p42_p0 }
   0x7   :  { %50 = shalt.err (!%p47_p2)
}
   0x8   :  { %s51_s15 = scalar_lea.vmem %s15_s7, 128  ;;  %p56_p4 = scmp.lt.s32.totalorder %s15_s7, %s15_s7 }
   0x9   :  { %p52_p3 = scmp.ne.s32.totalorder %s15_s7, %s51_s15  ;;  %p57_p5 = scmp.lt.s32.totalorder %s51_s15, %s51_s15 }
   0xb   :  { %p58_p6 = por %p57_p5, %p56_p4 }
   0xd   :  { %p59_p7 = pnand %p58_p6, %p52_p3 }
   0xf   :  { %62 = shalt.err (!%p59_p7)
}
  0x10   :  { %17 = dma.hbm_to_vmem [thread:$0]  %s125_s0, 128, %s15_s7, [#allocation3]  }
  0x11   :  { %85 = dma.done.wait [#allocation3], 128  }
  0x12   :  { %86 = vsyncadd [#allocation3], 4294967168  ;;  %s90_s18 = smov [#allocation5]   ;;  %v21_v0 = vld [vmem:[#allocation2] sm:$0xff] }
  0x13   :  { %s30_s19 = sshll.u32 %s90_s18, 4  ;;  %v22_v1 = vrot.slane %v21_v0, 7  ;;  %s31_s19 = int_to_ptr.vmem [resolvable:$true] %s30_s19 }
  0x14   :  { %s63_s20 = scalar_lea.vmem %s31_s19, 128  ;;  %p68_p9 = scmp.lt.s32.totalorder %s31_s19, %s31_s19 }
  0x15   :  { %23 = vst [vmem:[#allocation5] sm:$0xff] %v22_v1  ;;  %p64_p8 = scmp.ne.s32.totalorder %s31_s19, %s63_s20  ;;  %p69_p10 = scmp.lt.s32.totalorder %s63_s20, %s63_s20 }
  0x17   :  { %p70_p11 = por %p69_p10, %p68_p9 }
  0x19   :  { %p71_p12 = pnand %p70_p11, %p64_p8 }
  0x1b   :  { %74 = shalt.err (!%p71_p12)
}
  0x1c   :  { %s75_s23 = scalar_lea.hbm %s126_s1, 128 }
  0x1d   :  { %p76_p13 = scmp.ne.s32.totalorder %s126_s1, %s75_s23  ;;  %p79_p0 = scmp.lt.u32.totalorder %s75_s23, %s126_s1 }
  0x1f   :  { %p81_p1 = pnand %p79_p0, %p76_p13 }
  0x21   :  { %84 = shalt.err (!%p81_p1)
}
  0x22   :  { %33 = dma.vmem_to_hbm [thread:$0]  %s31_s19, 128, %s126_s1, [#allocation4]  }
  0x23   :  { %87 = dma.done.wait [#allocation4], 128  }
  0x24   :  { %88 = vsyncadd [#allocation4], 4294967168 }
  0x25   :  { %37 = vsyncpa [#allocation3], 1 }
  0x26   :  { %38 = vsyncpa [#allocation4], 1 }

// kernel: tpu_custom_call.1
= control target key start
LH: loop header
LB: loop body
LE: loop exit
PB: predicated region body
PF: predicated region fallthrough
CT: control target
= control target key end

     0   :  { %7 = vsyncpa [#allocation3], 0  ;;  %s479_s0 = inlined_call_operand.hbm [shape: f32[8,128], index: 0, kind: input, shape index: {}]   ;;  %s480_s1 = inlined_call_operand.hbm [shape: f32[8,128], index: 1, kind: input, shape index: {}]   ;;  %s481_s2 = inlined_call_operand.hbm [shape: f32[8,128], index: 2, kind: output, shape index: {}]  }
   0x1   :  { %8 = vsyncpa [#allocation6], 0 }
   0x2   :  { %9 = vsyncpa [#allocation4], 0  ;;  %s363_s9 = smov 0  }
   0x3 LB: > { %s196_s10 = sadd.s32 4294967295, %s343_s9   ;;  %p197_p0 = scmp.ge.s32.totalorder %s343_s9, 1  ;;  %s343_s9 = sphi %s363_s9, %s15_s9  }
   0x4   : > { %p83_p1 = scmp.lt.s32.totalorder %s343_s9, 5  ;;  %p373_p2 = scmp.eq.s32.totalorder %s196_s10, 0 }
   0x5   : > { %s345_s13 = smov [#allocation2]   ;;  %s346_s15 = smov [#allocation5]  }
   0x6   : > { %s485_s11 = scalar_select %p373_p2, 1, 0 }
   0x7   : > { %p377_p3 = pnand %p197_p0, %p83_p1  ;;  %s96_s14 = sshll.u32 %s345_s13, 4  ;;  %s97_s14 = int_to_ptr.vmem [resolvable:$true] %s96_s14 }
   0x8   : > { %s107_s16 = sshll.u32 %s346_s15, 4  ;;  %s243_s20 = scalar_lea.hbm %s479_s0, 128  ;;  %s389_s16 = int_to_ptr.vmem [resolvable:$true] %s107_s16 }
   0x9   : > { %s486_s12 = scalar_select %p377_p3, 1, 0 }
   0xa   : > { %p219_p4 = pneg %p377_p3  ;;  %p244_p6 = scmp.ne.s32.totalorder %s479_s0, %s243_s20 }
   0xb   : > { %p250_p10 = scmp.lt.u32.totalorder %s243_s20, %s479_s0 }
   0xc   : > { %p385_p5 = pnand %p373_p2, %p219_p4 }
   0xe   : > { %p245_p7 = pneg %p385_p5 }
  0x10   : > { %p246_p8 = pnand %p245_p7, %p244_p6 }
  0x12   : > { %p247_p9 = pneg %p246_p8 }
  0x14   : > { %p252_p11 = pnand %p250_p10, %p247_p9 }
  0x16   : > { %255 = shalt.err (!%p252_p11)
}
  0x17   : > { %s256_s25 = scalar_lea.vmem %s97_s14, 128  ;;  %p264_p1 = scmp.lt.s32.totalorder %s97_s14, %s97_s14 }
  0x18   : > { %p257_p12 = scmp.ne.s32.totalorder %s97_s14, %s256_s25  ;;  %p265_p4 = scmp.lt.s32.totalorder %s256_s25, %s256_s25 }
  0x1a   : > { %p259_p13 = pnand %p257_p12, %p245_p7  ;;  %p266_p2 = por %p265_p4, %p264_p1 }
  0x1c   : > { %p260_p0 = pneg %p259_p13 }
  0x1e   : > { %p267_p3 = pnand %p266_p2, %p260_p0 }
  0x20   : > { %270 = shalt.err (!%p267_p3)
}
  0x21   : > { %222 = dma.hbm_to_vmem [thread:$0]  (!%p385_p5), %s479_s0, 128, %s97_s14, [#allocation3]  }
  0x22   : > { %s271_s30 = scalar_lea.hbm %s480_s1, 128 }
  0x23   : > { %p272_p6 = scmp.ne.s32.totalorder %s480_s1, %s271_s30  ;;  %p278_p3 = scmp.lt.u32.totalorder %s271_s30, %s480_s1 }
  0x25   : > { %p274_p8 = pnand %p272_p6, %p245_p7 }
  0x27   : > { %p275_p2 = pneg %p274_p8 }
  0x29   : > { %p280_p9 = pnand %p278_p3, %p275_p2 }
  0x2b   : > { %283 = shalt.err (!%p280_p9)
}
  0x2c   : > { %s284_s7 = scalar_lea.vmem %s389_s16, 128  ;;  %p292_p13 = scmp.lt.s32.totalorder %s389_s16, %s389_s16 }
  0x2d   : > { %p285_p10 = scmp.ne.s32.totalorder %s389_s16, %s284_s7  ;;  %p293_p0 = scmp.lt.s32.totalorder %s284_s7, %s284_s7 }
  0x2f   : > { %p287_p11 = pnand %p285_p10, %p245_p7  ;;  %p294_p1 = por %p293_p0, %p292_p13 }
  0x31   : > { %p288_p12 = pneg %p287_p11 }
  0x33   : > { %p295_p4 = pnand %p294_p1, %p288_p12 }
  0x35   : > { %298 = shalt.err (!%p295_p4)
}
  0x36   : > { %225 = dma.hbm_to_vmem [thread:$0]  (!%p385_p5), %s480_s1, 128, %s389_s16, [#allocation6]  }
  0x37   : > { %p488_p6 = scmp.ne.s32.totalorder %s486_s12, 0 }
  0x38   : > { %p489_p8 = scmp.ne.s32.totalorder (!%p488_p6), %s485_s11, 0 }
  0x39   : > { %120 = sbr.rel (%p488_p6) target bundleno = 92 (0x5c), region = 28 }
  0x40   : > { %330 = dma.done.wait (%p489_p8), [#allocation3], 128  }
  0x41   : > { %332 = vsyncadd (%p489_p8), [#allocation3], 4294967168 }
  0x42   : > { %334 = dma.done.wait (%p489_p8), [#allocation6], 128  }
  0x43   : > { %336 = vsyncadd (%p489_p8), [#allocation6], 4294967168  ;;  %s347_s14 = smov [#allocation7]   ;;  %v136_v0 = vld [vmem:[#allocation2] sm:$0xff]  ;;  %v137_v1 = vld [vmem:[#allocation5] sm:$0xff]  ;;  %p450_p5 = scmp.eq.s32.totalorder %s196_s10, 3 }
  0x44   : > { %s147_s15 = sshll.u32 %s347_s14, 4  ;;  %v138_v2 = vadd.f32 %v137_v1, %v136_v0  ;;  %s148_s15 = int_to_ptr.vmem [resolvable:$true] %s147_s15 }
  0x45   : > { %s299_s16 = scalar_lea.vmem %s148_s15, 128  ;;  %p306_p9 = scmp.lt.s32.totalorder %s148_s15, %s148_s15 }
  0x46   : > { %139 = vst [vmem:[#allocation7] sm:$0xff] %v138_v2  ;;  %p300_p7 = scmp.ne.s32.totalorder %s148_s15, %s299_s16  ;;  %p307_p10 = scmp.lt.s32.totalorder %s299_s16, %s299_s16 }
  0x48   : > { %p301_p2 = pnand %p300_p7, %p450_p5  ;;  %p308_p11 = por %p307_p10, %p306_p9 }
  0x4a   : > { %p302_p3 = pneg %p301_p2 }
  0x4c   : > { %p309_p12 = pnand %p308_p11, %p302_p3 }
  0x4e   : > { %312 = shalt.err (!%p309_p12)
}
  0x4f   : > { %s313_s10 = scalar_lea.hbm %s481_s2, 128 }
  0x50   : > { %p314_p13 = scmp.ne.s32.totalorder %s481_s2, %s313_s10  ;;  %p319_p4 = scmp.lt.u32.totalorder %s313_s10, %s481_s2 }
  0x52   : > { %p315_p0 = pnand %p314_p13, %p450_p5 }
  0x54   : > { %p316_p1 = pneg %p315_p0 }
  0x56   : > { %p321_p6 = pnand %p319_p4, %p316_p1 }
  0x58   : > { %324 = shalt.err (!%p321_p6)
}
  0x59   : > { %216 = dma.vmem_to_hbm [thread:$0]  (%p450_p5), %s148_s15, 128, %s481_s2, [#allocation4]  }
  0x5a   : > { %338 = dma.done.wait (%p450_p5), [#allocation4], 128  }
  0x5b   : > { %340 = vsyncadd (%p450_p5), [#allocation4], 4294967168 }
  0x5c PF: > { %s15_s9 = sadd.s32 1, %s343_s9  }
  0x5d   : > { %p12_p8 = scmp.ge.s32.totalorder %s15_s9, 6  }
  0x5f   :  { %14 = sbr.rel (!%p12_p8) target bundleno = 3 (0x3), region = 61 }
  0x66   :  { %160 = vsyncpa [#allocation3], 1 }
  0x67   :  { %162 = vsyncpa [#allocation3 + $0x1], 1 }
  0x68   :  { %163 = vsyncpa [#allocation6], 1 }
  0x69   :  { %164 = vsyncpa [#allocation4], 1 }
  0x6a   :  { %166 = vsyncpa [#allocation4 + $0x1], 1 }

// kernel: _forward_impl.1
= control target key start
LH: loop header
LB: loop body
LE: loop exit
PB: predicated region body
PF: predicated region fallthrough
CT: control target
= control target key end

     0   :  { %v982_v0 = vmov 0.0   ;;  %vm983_vm0 = vmmov 0   ;;  %vm59_vm1 = vcmask 130048   ;;  %v104_v8 = vlaneseq  ;;  %s985_s25 = smov 64   ;;  %s1273_s1 = inlined_call_operand.vmem [shape: bf16[16,32], index: 1, kind: input, shape index: {}]   ;;  %s1274_s0 = inlined_call_operand.vmem [shape: bf16[16,16], index: 0, kind: input, shape index: {}]   ;;  %s1275_s3 = inlined_call_operand.vmem [shape: bf16[2,96,32], index: 3, kind: input, shape index: {}]   ;;  %s1276_s2 = inlined_call_operand.vmem [shape: f32[1,32], index: 2, kind: input, shape index: {}]   ;;  %s1277_s5 = inlined_call_operand.vmem [shape: bf16[2,96,32], index: 5, kind: input, shape index: {}]   ;;  %s1278_s4 = inlined_call_operand.vmem [shape: f32[2,1,32], index: 4, kind: input, shape index: {}]   ;;  %s1279_s6 = inlined_call_operand.vmem [shape: f32[2,1,32], index: 6, kind: input, shape index: {}]   ;;  %s1280_s7 = inlined_call_operand.vmem [shape: bf16[32,128], index: 7, kind: input, shape index: {}]   ;;  %s1281_s8 = inlined_call_operand.vmem [shape: f32[1,128], index: 8, kind: input, shape index: {}]   ;;  %s1282_s9 = inlined_call_operand.vmem [shape: f32[16,128], index: 9, kind: output, shape index: {}]  }
   0x1   :  { %872 = vmatprep.subr.bf16.mxu0 %v982_v0  ;;  %v954_v1 = vld [vmem:[%s1273_s1] sm:$0xff]   ;;  %874 = vmatprep.mubr.msk.bf16.mxu0 %vm983_vm0, %v982_v0  ;;  %v957_v4 = vld [vmem:[%s1275_s3 + $0x8] sm:$0xff]   ;;  %v958_v5 = vld [vmem:[%s1275_s3 + $0x10] sm:$0xff]   ;;  %vm168_vm4 = vcmask 1046528   ;;  %vm160_vm7 = vcmask 1040384   ;;  %vm187_vm8 = vcmask 261120  }
   0x2   :  { %v955_v2 = vld [vmem:[%s1274_s0] sm:$0xff]   ;;  %878 = vmatprep.subr.bf16.mxu1 %v982_v0  ;;  %890 = vmatprep.mubr.msk.bf16.mxu1 %vm983_vm0, %v982_v0  ;;  %v959_v6 = vld [vmem:[%s1275_s3 + $0x18] sm:$0xff]   ;;  %v105_v9 = vshrl.u32 %v104_v8, 7  ;;  %v961_v11 = vld [vmem:[%s1275_s3 + $0x28] sm:$0xff]   ;;  %vm191_vm9 = vcmask 523264   ;;  %vm236_vm10 = vcmask 785408  }
   0x3   :  { %873 = vmatpush3.bf16.msra.mxu0 %v954_v1  ;;  %v956_v3 = vld [vmem:[%s1275_s3] sm:$0xff]   ;;  %v963_v45 = vld [vmem:[%s1277_s5 + $0x8] sm:$0xff]   ;;  %v964_v46 = vld [vmem:[%s1277_s5 + $0x10] sm:$0xff]  }
   0x4   :  { %894 = vmatprep.subr.bf16.mxu0 %v982_v0  ;;  %879 = vmatpush3.bf16.msra.mxu1 %v956_v3  ;;  %v960_v7 = vld [vmem:[%s1275_s3 + $0x20] sm:$0xff]   ;;  %v106_v10 = vadd.s32 8, %v105_v9  ;;  %v111_v12 = vand.u32 7, %v105_v9  ;;  %v965_v47 = vld [vmem:[%s1277_s5 + $0x18] sm:$0xff]   ;;  %v967_v49 = vld [vmem:[%s1277_s5 + $0x28] sm:$0xff]  }
   0x5   :  { %880 = vmatprep.subr.bf16.mxu1 %v982_v0  ;;  %v769_v13 = vld [vmem:[%s1276_s2] ss:$0 sm:$0xff]  ;;  %s984_s2 = smov 32  }
   0x6   :  { %875 = vmatmul.mubr.msk.bf16.vlgmr.msra.gmra.mrb[0].mxu0 %vm59_vm1, %v955_v2  ;;  %v118_v14 = vand.u32 7, %v106_v10  ;;  %vm137_vm2 = vcmp.ne.s32.totalorder %v111_v12, 7  ;;  %vm131_vm5 = vcmp.ne.s32.totalorder %v111_v12, 0  ;;  %v962_v44 = vld [vmem:[%s1277_s5] sm:$0xff]  }
   0x7   :  { %906 = vmatprep.mubr.msk.bf16.mxu0 %vm983_vm0, %v982_v0  ;;  %v1083_v21 = vsel %vm137_vm2, 1.0, %v982_v0  ;;  %v1101_v33 = vsel %vm131_vm5, 1.0, %v982_v0  ;;  %895 = vmatpush3.bf16.msra.mxu0 %v962_v44  ;;  %v966_v48 = vld [vmem:[%s1277_s5 + $0x20] sm:$0xff]  }
   0x8   :  { %881 = vmatpush3.bf16.msra.mxu1 %v957_v4  ;;  %vm138_vm3 = vcmp.ne.s32.totalorder %v118_v14, 7  ;;  %vm132_vm6 = vcmp.ne.s32.totalorder %v118_v14, 0  ;;  %896 = vmatprep.subr.bf16.mxu0 %v982_v0  ;;  %v777_v50 = vld [vmem:[%s1278_s4] ss:$0 sm:$0xff] }
   0x9   :  { %882 = vmatprep.subr.bf16.mxu1 %v982_v0  ;;  %v1090_v25 = vsel %vm138_vm3, 1.0, %v982_v0  ;;  %v1104_v34 = vsel %vm132_vm6, 1.0, %v982_v0 }
   0xb   :  { %897 = vmatpush3.bf16.msra.mxu0 %v963_v45 }
   0xc   :  { %883 = vmatpush3.bf16.msra.mxu1 %v958_v5  ;;  %898 = vmatprep.subr.bf16.mxu0 %v982_v0 }
   0xd   :  { %884 = vmatprep.subr.bf16.mxu1 %v982_v0 }
   0xf   :  { %899 = vmatpush3.bf16.msra.mxu0 %v964_v46 }
  0x10   :  { %885 = vmatpush3.bf16.msra.mxu1 %v959_v6  ;;  %900 = vmatprep.subr.bf16.mxu0 %v982_v0 }
  0x11   :  { %886 = vmatprep.subr.bf16.mxu1 %v982_v0 }
  0x13   :  { %901 = vmatpush3.bf16.msra.mxu0 %v965_v47 }
  0x14   :  { %887 = vmatpush3.bf16.msra.mxu1 %v960_v7  ;;  %902 = vmatprep.subr.bf16.mxu0 %v982_v0 }
  0x15   :  { %888 = vmatprep.subr.bf16.mxu1 %v982_v0 }
  0x17   :  { %903 = vmatpush3.bf16.msra.mxu0 %v966_v48 }
  0x18   :  { %889 = vmatpush3.bf16.msra.mxu1 %v961_v11  ;;  %904 = vmatprep.subr.bf16.mxu0 %v982_v0 }
  0x19   :  { %910 = vmatprep.subr.bf16.mxu1 %v982_v0 }
  0x1b   :  { %905 = vmatpush3.bf16.msra.mxu0 %v967_v49 }
  0x1c   :  { %926 = vmatprep.subr.bf16.mxu0 %v982_v0 }
  0xd9   :  { %v97_v15 = vpop.f32.mrb[0].mxu0 }
  0xda   :  { %v1078_v16 = vadd.f32 %v769_v13, %v97_v15  ;;  %v876_v17 = vpop.f32.mrb[1].mxu0  ;;  %v968_v15 = vld [vmem:[%s1275_s3 + $0x30] sm:$0xff]  }
  0xdb   :  { %v100_v18 = vpop.f32.mrb[2].mxu0  ;;  %v969_v17 = vld [vmem:[%s1275_s3 + $0x38] sm:$0xff]  }
  0xdc   :  { %v1080_v19 = vadd.f32 %v769_v13, %v100_v18  ;;  %v877_v20 = vpop.f32.mrb[3].mxu0  ;;  %v169_v22 = vrot.slane %v1078_v16, 1  ;;  %v161_v32 = vrot.slane %v1078_v16, 7  ;;  %v970_v18 = vld [vmem:[%s1275_s3 + $0x40] sm:$0xff]  }
  0xdd   :  { %v971_v20 = vld [vmem:[%s1275_s3 + $0x48] sm:$0xff]  }
  0xde   :  { %v170_v23 = vrot.slane %v1080_v19, 1  ;;  %v179_v24 = vpack.c.bf16 %v1080_v19, %v1078_v16  ;;  %v157_v31 = vrot.slane %v1080_v19, 7 }
  0xe0   :  { %182 = vrot.lane.b32.xlu0 %v179_v24, %s984_s2  ;;  %v171_v26 = vsel %vm168_vm4, %v169_v22, %v170_v23  ;;  %v175_v27 = vsel %vm168_vm4, %v170_v23, %v169_v22  ;;  %v162_v35 = vsel %vm160_vm7, %v161_v32, %v157_v31  ;;  %v165_v36 = vsel %vm160_vm7, %v157_v31, %v161_v32  ;;  %v972_v22 = vld [vmem:[%s1275_s3 + $0x50] sm:$0xff]   ;;  %v785_v23 = vld [vmem:[%s1279_s6] ss:$0 sm:$0xff]  ;;  %v973_v24 = vld [vmem:[%s1275_s3 + $0x58] sm:$0xff]  }
  0xe1   :  { %v176_v28 = vmul.f32 %v1083_v21, %v171_v26  ;;  %v177_v29 = vmul.f32 %v1090_v25, %v175_v27  ;;  %v166_v37 = vmul.f32 %v1101_v33, %v165_v36  ;;  %v167_v38 = vmul.f32 %v1104_v34, %v162_v35 }
  0xe3   :  { %v180_v30 = vpack.c.bf16 %v177_v29, %v176_v28  ;;  %v178_v40 = vpack.c.bf16 %v167_v38, %v166_v37 }
  0xe5   :  { %185 = vrot.lane.b32.xlu0 %v180_v30, %s985_s25 }
 0x152   :  { %v183_v39 = vpop.permute.xlu0 %182 }
 0x153   :  { %v190_v41 = vsel %vm187_vm8, %v178_v40, %v183_v39 }
 0x157   :  { %v186_v42 = vpop.permute.xlu0 %185 }
 0x158   :  { %v193_v43 = vsel %vm191_vm9, %v190_v41, %v186_v42 }
 0x159   :  { %891 = vmatmul.mubr.msk.bf16.vlgmr.msra.gmra.mrb[0].mxu1 %vm236_vm10, %v193_v43 }
 0x15a   :  { %922 = vmatprep.mubr.msk.bf16.mxu1 %vm983_vm0, %v982_v0  ;;  %911 = vmatpush3.bf16.msra.mxu1 %v968_v15 }
 0x15b   :  { %912 = vmatprep.subr.bf16.mxu1 %v982_v0 }
 0x15e   :  { %913 = vmatpush3.bf16.msra.mxu1 %v969_v17 }
 0x15f   :  { %914 = vmatprep.subr.bf16.mxu1 %v982_v0 }
 0x162   :  { %915 = vmatpush3.bf16.msra.mxu1 %v970_v18 }
 0x163   :  { %916 = vmatprep.subr.bf16.mxu1 %v982_v0 }
 0x166   :  { %917 = vmatpush3.bf16.msra.mxu1 %v971_v20 }
 0x167   :  { %918 = vmatprep.subr.bf16.mxu1 %v982_v0 }
 0x16a   :  { %919 = vmatpush3.bf16.msra.mxu1 %v972_v22 }
 0x16b   :  { %920 = vmatprep.subr.bf16.mxu1 %v982_v0 }
 0x16e   :  { %921 = vmatpush3.bf16.msra.mxu1 %v973_v24 }
 0x16f   :  { %942 = vmatprep.subr.bf16.mxu1 %v982_v0 }
 0x22c   :  { %v273_v51 = vpop.f32.mrb[0].mxu1 }
 0x22d   :  { %v274_v52 = vadd.f32 %v777_v50, %v273_v51  ;;  %v892_v53 = vpop.f32.mrb[1].mxu1 }
 0x22e   :  { %v276_v54 = vpop.f32.mrb[2].mxu1 }
 0x22f   :  { %v280_v55 = vmax.f32 %v274_v52, 0.0  ;;  %v277_v56 = vadd.f32 %v777_v50, %v276_v54  ;;  %v893_v57 = vpop.f32.mrb[3].mxu1 }
 0x230   :  { %v976_v57 = vld [vmem:[%s1277_s5 + $0x40] sm:$0xff]  }
 0x231   :  { %v281_v58 = vmax.f32 %v277_v56, 0.0  ;;  %v299_v59 = vrot.slane %v280_v55, 7  ;;  %v306_v60 = vrot.slane %v280_v55, 1  ;;  %v975_v56 = vld [vmem:[%s1277_s5 + $0x38] sm:$0xff]  }
 0x233   :  { %v296_v61 = vrot.slane %v281_v58, 7  ;;  %v307_v62 = vrot.slane %v281_v58, 1  ;;  %v316_v63 = vpack.c.bf16 %v281_v58, %v280_v55  ;;  %v974_v55 = vld [vmem:[%s1277_s5 + $0x30] sm:$0xff]   ;;  %v977_v58 = vld [vmem:[%s1277_s5 + $0x48] sm:$0xff]  }
 0x235   :  { %319 = vrot.lane.b32.xlu1 %v316_v63, %s984_s2  ;;  %v308_v1 = vsel %vm168_vm4, %v306_v60, %v307_v62  ;;  %v312_v2 = vsel %vm168_vm4, %v307_v62, %v306_v60  ;;  %v300_v3 = vsel %vm160_vm7, %v299_v59, %v296_v61  ;;  %v303_v4 = vsel %vm160_vm7, %v296_v61, %v299_v59  ;;  %v978_v59 = vld [vmem:[%s1277_s5 + $0x50] sm:$0xff]   ;;  %v979_v60 = vld [vmem:[%s1277_s5 + $0x58] sm:$0xff]   ;;  %v806_v61 = vld [vmem:[%s1278_s4 + $0x1] ss:$0 sm:$0xff] }
 0x236   :  { %v313_v5 = vmul.f32 %v1083_v21, %v308_v1  ;;  %v314_v6 = vmul.f32 %v1090_v25, %v312_v2  ;;  %v304_v7 = vmul.f32 %v1101_v33, %v303_v4  ;;  %v305_v8 = vmul.f32 %v1104_v34, %v300_v3 }
 0x238   :  { %v317_v9 = vpack.c.bf16 %v314_v6, %v313_v5  ;;  %v315_v10 = vpack.c.bf16 %v305_v8, %v304_v7 }
 0x23a   :  { %322 = vrot.lane.b32.xlu1 %v317_v9, %s985_s25 }
 0x2a7   :  { %v320_v11 = vpop.permute.xlu1 %319 }
 0x2a8   :  { %v326_v12 = vsel %vm187_vm8, %v315_v10, %v320_v11 }
 0x2ac   :  { %v323_v13 = vpop.permute.xlu1 %322 }
 0x2ad   :  { %v328_v14 = vsel %vm191_vm9, %v326_v12, %v323_v13 }
 0x2ae   :  { %907 = vmatmul.mubr.msk.bf16.vlgmr.msra.gmra.mrb[4].mxu0 %vm236_vm10, %v328_v14 }
 0x2af   :  { %938 = vmatprep.mubr.msk.bf16.mxu0 %vm983_vm0, %v982_v0  ;;  %927 = vmatpush3.bf16.msra.mxu0 %v974_v55 }
 0x2b0   :  { %928 = vmatprep.subr.bf16.mxu0 %v982_v0 }
 0x2b3   :  { %929 = vmatpush3.bf16.msra.mxu0 %v975_v56 }
 0x2b4   :  { %930 = vmatprep.subr.bf16.mxu0 %v982_v0 }
 0x2b7   :  { %931 = vmatpush3.bf16.msra.mxu0 %v976_v57 }
 0x2b8   :  { %932 = vmatprep.subr.bf16.mxu0 %v982_v0 }
 0x2bb   :  { %933 = vmatpush3.bf16.msra.mxu0 %v977_v58 }
 0x2bc   :  { %934 = vmatprep.subr.bf16.mxu0 %v982_v0 }
 0x2bf   :  { %935 = vmatpush3.bf16.msra.mxu0 %v978_v59 }
 0x2c0   :  { %936 = vmatprep.subr.bf16.mxu0 %v982_v0 }
 0x2c3   :  { %937 = vmatpush3.bf16.msra.mxu0 %v979_v60 }
 0x381   :  { %v407_v26 = vpop.f32.mrb[4].mxu0 }
 0x382   :  { %v408_v27 = vadd.f32 %v785_v23, %v407_v26  ;;  %v908_v28 = vpop.f32.mrb[5].mxu0 }
 0x383   :  { %v410_v29 = vpop.f32.mrb[6].mxu0 }
 0x384   :  { %v414_v30 = vadd.f32 %v408_v27, %v1078_v16  ;;  %v411_v31 = vadd.f32 %v785_v23, %v410_v29  ;;  %v909_v32 = vpop.f32.mrb[7].mxu0 }
 0x386   :  { %v1185_v35 = vmax.f32 %v414_v30, 0.0  ;;  %v415_v36 = vadd.f32 %v411_v31, %v1080_v19 }
 0x388   :  { %v1188_v37 = vmax.f32 %v415_v36, 0.0  ;;  %v444_v38 = vrot.slane %v1185_v35, 1  ;;  %v437_v45 = vrot.slane %v1185_v35, 7 }
 0x38a   :  { %v445_v39 = vrot.slane %v1188_v37, 1  ;;  %v454_v40 = vpack.c.bf16 %v1188_v37, %v1185_v35  ;;  %v434_v44 = vrot.slane %v1188_v37, 7 }
 0x38c   :  { %457 = vrot.lane.b32.xlu0 %v454_v40, %s984_s2  ;;  %v446_v41 = vsel %vm168_vm4, %v444_v38, %v445_v39  ;;  %v450_v16 = vsel %vm168_vm4, %v445_v39, %v444_v38  ;;  %v438_v46 = vsel %vm160_vm7, %v437_v45, %v434_v44  ;;  %v441_v47 = vsel %vm160_vm7, %v434_v44, %v437_v45 }
 0x38d   :  { %v451_v42 = vmul.f32 %v1083_v21, %v446_v41  ;;  %v452_v43 = vmul.f32 %v1090_v25, %v450_v16  ;;  %v442_v48 = vmul.f32 %v1101_v33, %v441_v47  ;;  %v443_v49 = vmul.f32 %v1104_v34, %v438_v46 }
 0x38f   :  { %v455_v19 = vpack.c.bf16 %v452_v43, %v451_v42  ;;  %v453_v51 = vpack.c.bf16 %v443_v49, %v442_v48  ;;  %v835_v43 = vld [vmem:[%s1281_s8] ss:$0 sm:$0xff] }
 0x391   :  { %460 = vrot.lane.b32.xlu1 %v455_v19, %s985_s25 }
 0x3fe   :  { %v458_v50 = vpop.permute.xlu0 %457 }
 0x3ff   :  { %v464_v52 = vsel %vm187_vm8, %v453_v51, %v458_v50 }
 0x403   :  { %v461_v53 = vpop.permute.xlu1 %460 }
 0x404   :  { %v466_v54 = vsel %vm191_vm9, %v464_v52, %v461_v53 }
 0x405   :  { %923 = vmatmul.mubr.msk.bf16.vlgmr.msra.gmra.mrb[4].mxu1 %vm236_vm10, %v466_v54 }
 0x406   :  { %946 = vmatprep.mubr.msk.bf16.mxu1 %vm983_vm0, %v982_v0 }
 0x4d8   :  { %v545_v62 = vpop.f32.mrb[4].mxu1 }
 0x4d9   :  { %v546_v63 = vadd.f32 %v806_v61, %v545_v62  ;;  %v924_v1 = vpop.f32.mrb[5].mxu1 }
 0x4da   :  { %v548_v2 = vpop.f32.mrb[6].mxu1 }
 0x4db   :  { %v552_v3 = vmax.f32 %v546_v63, 0.0  ;;  %v549_v4 = vadd.f32 %v806_v61, %v548_v2  ;;  %v925_v5 = vpop.f32.mrb[7].mxu1 }
 0x4dd   :  { %v553_v6 = vmax.f32 %v549_v4, 0.0  ;;  %v573_v7 = vrot.slane %v552_v3, 7  ;;  %v580_v8 = vrot.slane %v552_v3, 1 }
 0x4df   :  { %v570_v9 = vrot.slane %v553_v6, 7  ;;  %v581_v10 = vrot.slane %v553_v6, 1  ;;  %v590_v11 = vpack.c.bf16 %v553_v6, %v552_v3 }
 0x4e1   :  { %593 = vrot.lane.b32.xlu0 %v590_v11, %s984_s2  ;;  %v582_v12 = vsel %vm168_vm4, %v580_v8, %v581_v10  ;;  %v586_v13 = vsel %vm168_vm4, %v581_v10, %v580_v8  ;;  %v574_v14 = vsel %vm160_vm7, %v573_v7, %v570_v9  ;;  %v577_v15 = vsel %vm160_vm7, %v570_v9, %v573_v7 }
 0x4e2   :  { %v587_v17 = vmul.f32 %v1083_v21, %v582_v12  ;;  %v588_v18 = vmul.f32 %v1090_v25, %v586_v13  ;;  %v578_v20 = vmul.f32 %v1101_v33, %v577_v15  ;;  %v579_v22 = vmul.f32 %v1104_v34, %v574_v14  ;;  %v980_v21 = vld [vmem:[%s1280_s7] sm:$0xff]   ;;  %v981_v25 = vld [vmem:[%s1280_s7 + $0x8] sm:$0xff]  }
 0x4e3   :  { %943 = vmatpush3.bf16.msra.mxu1 %v980_v21  ;;  %v827_v33 = vld [vmem:[%s1279_s6 + $0x1] ss:$0 sm:$0xff] }
 0x4e4   :  { %v591_v23 = vpack.c.bf16 %v588_v18, %v587_v17  ;;  %v589_v24 = vpack.c.bf16 %v579_v22, %v578_v20  ;;  %944 = vmatprep.subr.bf16.mxu1 %v982_v0 }
 0x4e6   :  { %596 = vrot.lane.b32.xlu1 %v591_v23, %s985_s25 }
 0x4e7   :  { %945 = vmatpush3.bf16.msra.mxu1 %v981_v25 }
 0x553   :  { %v594_v26 = vpop.permute.xlu0 %593 }
 0x554   :  { %v600_v27 = vsel %vm187_vm8, %v589_v24, %v594_v26 }
 0x558   :  { %v597_v28 = vpop.permute.xlu1 %596 }
 0x559   :  { %v602_v29 = vsel %vm191_vm9, %v600_v27, %v597_v28 }
 0x55a   :  { %939 = vmatmul.mubr.msk.bf16.vlgmr.msra.gmra.mrb[8].mxu0 %vm236_vm10, %v602_v29 }
 0x62d   :  { %v681_v34 = vpop.f32.mrb[8].mxu0 }
 0x62e   :  { %v682_v30 = vadd.f32 %v827_v33, %v681_v34  ;;  %v940_v31 = vpop.f32.mrb[9].mxu0 }
 0x62f   :  { %v684_v32 = vpop.f32.mrb[10].mxu0 }
 0x630   :  { %v688_v36 = vadd.f32 %v682_v30, %v1185_v35  ;;  %v685_v38 = vadd.f32 %v827_v33, %v684_v32  ;;  %v941_v39 = vpop.f32.mrb[11].mxu0 }
 0x632   :  { %v689_v40 = vadd.f32 %v685_v38, %v1188_v37  ;;  %v690_v41 = vmax.f32 %v688_v36, 0.0 }
 0x634   :  { %v691_v16 = vmax.f32 %v689_v40, 0.0 }
 0x636   :  { %v692_v42 = vpack.c.bf16 %v691_v16, %v690_v41 }
 0x638   :  { %693 = vst.msk [vmem:[#allocation2] sm:$0xff] %vm187_vm8, %v692_v42 }
 0x63f   :  { %v694_v0 = vld [vmem:[#allocation2] sm:$0xff] }
 0x640   :  { %947 = vmatmul.mubr.msk.bf16.vlgmr.msra.gmra.mrb[8].mxu1 %vm187_vm8, %v694_v0 }
 0x713   :  { %v756_v19 = vpop.f32.mrb[8].mxu1 }
 0x714   :  { %v757_v44 = vadd.f32 %v835_v43, %v756_v19  ;;  %v948_v45 = vpop.f32.mrb[9].mxu1 }
 0x715   :  { %v759_v35 = vpop.f32.mrb[10].mxu1 }
 0x716   :  { %763 = vst [vmem:[%s1282_s9] sm:$0xff] %v757_v44  ;;  %v760_v37 = vadd.f32 %v835_v43, %v759_v35  ;;  %v949_v46 = vpop.f32.mrb[11].mxu1 }
 0x718   :  { %764 = vst [vmem:[%s1282_s9 + $0x8] sm:$0xff] %v760_v37 }

</bundles_post_ra>
